<compile_context>
chip_gen: v7x
topology: tpu7x:2x2x1
jax: 0.10.0
libtpu: 0.0.40
codegen_flags: <defaults>
</compile_context>

<pallas_src>
import jax
import jax.numpy as jnp
from jax.experimental import pallas as pl
from jax.experimental.pallas import tpu as pltpu


def selector_kernel(mask_ref, w1_ref, b1_ref, w2_ref, b2_ref, o_ref):
    # fc1: [B, M] @ [M, H] + [1, H]  (MXU, f32 accumulation)
    h = jnp.dot(mask_ref[...], w1_ref[...], preferred_element_type=jnp.float32)
    h = jnp.maximum(h + b1_ref[...], 0.0)  # ReLU
    # dropout (eval mode) == identity
    # fc2 as VPU elementwise mul by the lane-dense [1, H] weight row + XLU
    # lane reduction; b2 is a scalar read from SMEM.
    out = jnp.sum(h * w2_ref[...], axis=-1, keepdims=True) + b2_ref[0, 0]
    o_ref[...] = out.astype(o_ref.dtype)


def selector_forward(mask, loss, w1, b1, w2_row, b2):
    """mask: [B, mask_size]; loss is unused (matches Selector.forward).

    w1:     [mask_size, nhidden]  fc1 weight, pre-transposed for x @ W
    b1:     [1, nhidden]          fc1 bias
    w2_row: [1, nhidden]          fc2 weight (torch layout, lane-dense)
    b2:     [1, 1]                fc2 bias (scalar, placed in SMEM)
    """
    del loss  # unused by Selector.forward
    B, _ = mask.shape
    # Micro shapes: single invocation, full-array blocks, no grid.
    # If B ever grows large, tile only the batch axis (grid=(cdiv(B, bB),),
    # mask/out index on i, weights return (0, 0)), mark it "parallel", and
    # make the output lane-dense.
    return pl.pallas_call(
        selector_kernel,
        out_shape=jax.ShapeDtypeStruct((B, 1), jnp.float32),
        in_specs=[
            pl.BlockSpec(memory_space=pltpu.MemorySpace.VMEM),  # mask
            pl.BlockSpec(memory_space=pltpu.MemorySpace.VMEM),  # w1
            pl.BlockSpec(memory_space=pltpu.MemorySpace.VMEM),  # b1
            pl.BlockSpec(memory_space=pltpu.MemorySpace.VMEM),  # w2 row
            pl.BlockSpec(memory_space=pltpu.MemorySpace.SMEM),  # b2 scalar
        ],
        out_specs=pl.BlockSpec(memory_space=pltpu.MemorySpace.VMEM),
    )(mask, w1, b1, w2_row, b2)


def init_linear_params(key, in_features, out_features):
    """Deterministic init mirroring torch.nn.Linear defaults:
    U(-1/sqrt(fan_in), 1/sqrt(fan_in)) for both weight and bias.
    Weight is returned transposed to [in_features, out_features]."""
    k_w, k_b = jax.random.split(key)
    bound = 1.0 / jnp.sqrt(jnp.float32(in_features))
    w = jax.random.uniform(
        k_w, (in_features, out_features), jnp.float32, -bound, bound
    )
    b = jax.random.uniform(
        k_b, (1, out_features), jnp.float32, -bound, bound
    )
    return w, b


if __name__ == "__main__":
    # Small shapes consistent with the module.
    B = 8            # batch of masks
    mask_size = 32   # fc1 in_features
    nhidden = 32     # fc1 out_features / fc2 in_features

    key = jax.random.PRNGKey(0)
    k_mask, k_loss, k_fc1, k_fc2 = jax.random.split(key, 4)

    mask = jax.random.normal(k_mask, (B, mask_size), jnp.float32)
    loss = jax.random.normal(k_loss, (B, 1), jnp.float32)  # unused, like PyTorch

    w1, b1 = init_linear_params(k_fc1, mask_size, nhidden)   # fc1
    w2_t, b2 = init_linear_params(k_fc2, nhidden, 1)         # fc2
    w2_row = w2_t.reshape(1, nhidden)                        # lane-dense [1, H]
    b2 = b2.reshape(1, 1)                                    # scalar for SMEM

    out = selector_forward(mask, loss, w1, b1, w2_row, b2)
    out = jax.block_until_ready(out)

    # Pure-JAX reference check (eval-mode dropout == identity).
    ref = jnp.maximum(mask @ w1 + b1, 0.0) @ w2_row.T + b2
    assert out.shape == (B, 1)
    assert jnp.allclose(out, ref, atol=1e-5, rtol=1e-5)

    print("KERNEL_OK")
</pallas_src>

<mosaic_0001>
module attributes {stable_mosaic.version = 11 : i64} {
  func.func @selector_kernel(%arg0: memref<8x32xf32, #tpu.memory_space<vmem>>, %arg1: memref<32x32xf32, #tpu.memory_space<vmem>>, %arg2: memref<1x32xf32, #tpu.memory_space<vmem>>, %arg3: memref<1x32xf32, #tpu.memory_space<vmem>>, %arg4: memref<1x1xf32, #tpu.memory_space<smem>>, %arg5: memref<8x1xf32, #tpu.memory_space<vmem>>) attributes {dimension_semantics = [], scalar_prefetch = 0 : i64, scratch_operands = 0 : i64, tpu.core_type = #tpu.core_type<tc>} {
    %c0 = arith.constant 0 : index
    %c0_0 = arith.constant 0 : index
    %0 = vector.load %arg0[%c0, %c0_0] : memref<8x32xf32, #tpu.memory_space<vmem>>, vector<8x32xf32>
    %c0_1 = arith.constant 0 : index
    %c0_2 = arith.constant 0 : index
    %1 = vector.load %arg1[%c0_1, %c0_2] : memref<32x32xf32, #tpu.memory_space<vmem>>, vector<32x32xf32>
    %cst = arith.constant dense<0.000000e+00> : vector<8x32xf32>
    %2 = tpu.matmul %0, %1, %cst {dimension_numbers = #tpu.dot_dimension_numbers<[1], [0], [0], [1], [0, 0, 1, 1], [], []>} : vector<8x32xf32>, vector<32x32xf32>, vector<8x32xf32> -> vector<8x32xf32>
    %c0_3 = arith.constant 0 : index
    %c0_4 = arith.constant 0 : index
    %3 = vector.load %arg2[%c0_3, %c0_4] : memref<1x32xf32, #tpu.memory_space<vmem>>, vector<1x32xf32>
    %4 = vector.broadcast %3 : vector<1x32xf32> to vector<8x32xf32>
    %5 = arith.addf %2, %4 : vector<8x32xf32>
    %cst_5 = arith.constant 0.000000e+00 : f32
    %6 = vector.broadcast %cst_5 : f32 to vector<8x32xf32>
    %7 = arith.maximumf %5, %6 : vector<8x32xf32>
    %c0_6 = arith.constant 0 : index
    %c0_7 = arith.constant 0 : index
    %8 = vector.load %arg3[%c0_6, %c0_7] : memref<1x32xf32, #tpu.memory_space<vmem>>, vector<1x32xf32>
    %9 = vector.broadcast %8 : vector<1x32xf32> to vector<8x32xf32>
    %10 = arith.mulf %7, %9 : vector<8x32xf32>
    %cst_8 = arith.constant dense<0.000000e+00> : vector<8xf32>
    %11 = vector.multi_reduction <add>, %10, %cst_8 [1] : vector<8x32xf32> to vector<8xf32>
    %12 = vector.shape_cast %11 : vector<8xf32> to vector<8x1xf32>
    %c0_9 = arith.constant 0 : index
    %c0_10 = arith.constant 0 : index
    %13 = memref.load %arg4[%c0_9, %c0_10] : memref<1x1xf32, #tpu.memory_space<smem>>
    %14 = vector.broadcast %13 : f32 to vector<8x1xf32>
    %15 = arith.addf %12, %14 : vector<8x1xf32>
    %c0_11 = arith.constant 0 : index
    %c0_12 = arith.constant 0 : index
    %16 = vector.load %arg5[%c0_11, %c0_12] : memref<8x1xf32, #tpu.memory_space<vmem>>, vector<8x1xf32>
    tpu.vector_store %arg5[%c0_11, %c0_12], %15 {strides = array<i32>} : memref<8x1xf32, #tpu.memory_space<vmem>>, vector<8x1xf32>,
    return
  }
}

</mosaic_0001>

<bundles_post_ra>
// kernel: tpu_custom_call.1
= control target key start
LH: loop header
LB: loop body
LE: loop exit
PB: predicated region body
PF: predicated region fallthrough
CT: control target
= control target key end

     0   :  { %11 = vsyncpa [#allocation4], 0  ;;  %s316_s0 = inlined_call_operand.hbm [shape: f32[8,32], index: 0, kind: input, shape index: {}]   ;;  %s317_s1 = inlined_call_operand.hbm [shape: f32[32,32], index: 1, kind: input, shape index: {}]   ;;  %s318_s2 = inlined_call_operand.vmem [shape: f32[1,32], index: 2, kind: input, shape index: {}]   ;;  %s319_s3 = inlined_call_operand.vmem [shape: f32[1,32], index: 3, kind: input, shape index: {}]   ;;  %s320_s4 = inlined_call_operand.<no memory space> [shape: f32[1,1], index: 4, kind: input, shape index: {}]   ;;  %s321_s5 = inlined_call_operand.vmem [shape: f32[8,1], index: 5, kind: output, shape index: {}]  }
   0x1   :  { %12 = vsyncpa [#allocation6], 0  ;;  %s236_s18 = smov [#allocation3]   ;;  %s237_s20 = smov [#allocation5]  }
   0x2   :  { %s19_s19 = sshll.u32 %s236_s18, 4  ;;  %s28_s21 = sshll.u32 %s237_s20, 4  ;;  %s20_s19 = int_to_ptr.vmem [resolvable:$true] %s19_s19  ;;  %s273_s21 = int_to_ptr.vmem [resolvable:$true] %s28_s21 }
   0x3   :  { %s188_s24 = scalar_lea.hbm %s316_s0, 128 }
   0x4   :  { %p189_p0 = scmp.ne.s32.totalorder %s316_s0, %s188_s24  ;;  %p192_p1 = scmp.lt.u32.totalorder %s188_s24, %s316_s0 }
   0x6   :  { %p194_p2 = pnand %p192_p1, %p189_p0 }
   0x8   :  { %197 = shalt.err (!%p194_p2)
}
   0x9   :  { %s198_s29 = scalar_lea.vmem %s20_s19, 128  ;;  %p203_p4 = scmp.lt.s32.totalorder %s20_s19, %s20_s19 }
   0xa   :  { %p199_p3 = scmp.ne.s32.totalorder %s20_s19, %s198_s29  ;;  %p204_p5 = scmp.lt.s32.totalorder %s198_s29, %s198_s29 }
   0xc   :  { %p205_p6 = por %p204_p5, %p203_p4 }
   0xe   :  { %p206_p7 = pnand %p205_p6, %p199_p3 }
  0x10   :  { %209 = shalt.err (!%p206_p7)
}
  0x11   :  { %22 = dma.hbm_to_vmem [thread:$0]  %s316_s0, 128, %s20_s19, [#allocation4]  }
  0x12   :  { %s210_s9 = scalar_lea.hbm %s317_s1, 512 }
  0x13   :  { %p211_p8 = scmp.ne.s32.totalorder %s317_s1, %s210_s9  ;;  %p214_p9 = scmp.lt.u32.totalorder %s210_s9, %s317_s1 }
  0x15   :  { %p216_p10 = pnand %p214_p9, %p211_p8 }
  0x17   :  { %219 = shalt.err (!%p216_p10)
}
  0x18   :  { %s220_s14 = scalar_lea.vmem %s273_s21, 512  ;;  %p225_p12 = scmp.lt.s32.totalorder %s273_s21, %s273_s21 }
  0x19   :  { %p221_p11 = scmp.ne.s32.totalorder %s273_s21, %s220_s14  ;;  %p226_p13 = scmp.lt.s32.totalorder %s220_s14, %s220_s14 }
  0x1b   :  { %p227_p0 = por %p226_p13, %p225_p12 }
  0x1d   :  { %p228_p1 = pnand %p227_p0, %p221_p11 }
  0x1f   :  { %231 = shalt.err (!%p228_p1)
}
  0x20   :  { %s238_s0 = smov 128   ;;  %s239_s15 = smov 8  }
  0x21   :  { %34 = dma.hbm_to_vmem [thread:$0]  %s317_s1, 512, %s273_s21, [#allocation6], %s238_s0, %s238_s0, %s239_s15  }
  0x22   :  { %232 = dma.done.wait [#allocation4], 128  }
  0x23   :  { %233 = vsyncadd [#allocation4], 4294967168 }
  0x24   :  { %234 = dma.done.wait [#allocation6], 512  }
  0x25   :  { %235 = vsyncadd [#allocation6], 4294966784  ;;  %v240_v0 = vmov 0.0|0.0   ;;  %vm241_vm0 = vmmov 0   ;;  %v242_v1 = vmov 0.0   ;;  %v48_v2 = vld [vmem:[#allocation5] sm:$0xff]  ;;  %v146_v17 = vstv %s320_s4 }
  0x26   :  { %175 = vmatprep.subr.bf16.mxu0 %v240_v0  ;;  %172 = vmatprep.mubr.msk.f32.mxu0 %vm241_vm0, %v242_v1  ;;  %v49_v3 = vld [vmem:[#allocation5 + $0x8] sm:$0xff]  ;;  %v50_v4 = vld [vmem:[#allocation5 + $0x10] sm:$0xff]  ;;  %v51_v6 = vld [vmem:[#allocation5 + $0x18] sm:$0xff]  ;;  %vm59_vm1 = vcmask 261120   ;;  %vm148_vm2 = vcmask 7168  }
  0x27   :  { %v176_v5 = vpack.c.bf16 %v49_v3, %v48_v2  ;;  %v179_v7 = vpack.c.bf16 %v51_v6, %v50_v4  ;;  %v47_v8 = vld [vmem:[#allocation3] sm:$0xff] }
  0x28   :  { %v156_v9 = vld [vmem:[%s318_s2] ss:$0 sm:$0xff] }
  0x29   :  { %177 = vmatpush3.bf16.msra.mxu0 %v176_v5  ;;  %v158_v13 = vld [vmem:[%s319_s3] ss:$0 sm:$0xff] }
  0x2a   :  { %178 = vmatprep.subr.bf16.mxu0 %v240_v0 }
  0x2d   :  { %180 = vmatpush3.bf16.msra.mxu0 %v179_v7 }
  0x30   :  { %173 = vmatmul.mubr.msk.f32.vlgmr.msra.gmra.mrb[0].mxu0 %vm59_vm1, %v47_v8 }
 0x103   :  { %v129_v10 = vpop.f32.mrb[0].mxu0 }
 0x104   :  { %v130_v11 = vadd.f32 %v156_v9, %v129_v10  ;;  %v174_v12 = vpop.f32.mrb[1].mxu0 }
 0x106   :  { %v133_v14 = vmax.f32 %v130_v11, 0.0 }
 0x108   :  { %v141_v15 = vmul.f32 %v158_v13, %v133_v14 }
 0x10a   :  { %v142_v16 = vsel %vm59_vm1, %v141_v15, 0.0 }
 0x10b   :  { %143 = vadd.xlane.f32.xlu0 %v142_v16 }
 0x198   :  { %v144_v18 = vpop.xlane.xlu0 %143 }
 0x199   :  { %v147_v19 = vadd.f32 %v146_v17, %v144_v18 }
 0x19b   :  { %149 = vst.msk [vmem:[%s321_s5] sm:$0xff] %vm148_vm2, %v147_v19 }
 0x19c   :  { %154 = vsyncpa [#allocation4], 1 }
 0x19d   :  { %155 = vsyncpa [#allocation6], 1 }

</bundles_post_ra>
